<compile_context>
chip_gen: v7x
topology: tpu7x:2x2x1
jax: 0.10.0
libtpu: 0.0.40
codegen_flags: <defaults>
</compile_context>

<pallas_src>
import numpy as np
import jax
import jax.numpy as jnp
from jax.experimental import pallas as pl
from jax.experimental.pallas import tpu as pltpu


# ---------------------------------------------------------------------------
# Host-side constant bases (pure parameter preprocessing, no activation traffic)
# ---------------------------------------------------------------------------
def _build_bases(H, W, m1, m2, tH, tW):
    """Truncated forward rDFT2 basis E (H*W, 2*m1*m2) and inverse basis G (2*m1*m2, tH*tW)."""
    M = 2 * m1
    # retained H-frequency rows, ordered [0..m1-1, H-m1..H-1]  (matches [weights1; weights2])
    k_idx = np.concatenate([np.arange(m1), np.arange(H - m1, H)])          # (M,)
    c_idx = np.arange(m2)                                                  # (m2,)

    # ---- forward: x_ft[k, c] = sum_{h,w} x[h, w] * exp(-2πi (h k / H + w c / W)) ----
    hh = np.arange(H)
    ww = np.arange(W)
    ph = np.exp(-2j * np.pi * np.outer(hh, k_idx) / H)                     # (H, M)
    pw = np.exp(-2j * np.pi * np.outer(ww, c_idx) / W)                     # (W, m2)
    E = (ph[:, None, :, None] * pw[None, :, None, :]).reshape(H * W, M * m2)

    # ---- inverse: irfft2 of the sparse out_ft with s = (tH, tW) ----
    tWf = tW // 2 + 1
    pp = np.arange(tH)
    qq = np.arange(tW)
    # rows with index >= tH are trimmed away by the resize; surviving rows keep index k
    bh = np.exp(2j * np.pi * np.outer(pp, k_idx) / tH) / tH                # (tH, M)
    bh = bh * (k_idx[None, :] < tH)
    Gr = np.zeros((M, m2, tH, tW))
    Gi = np.zeros((M, m2, tH, tW))
    for ci, c in enumerate(c_idx):
        if c >= tWf:                      # column trimmed away by the resize
            continue
        if c == 0 or (tW % 2 == 0 and c == tW // 2):
            # DC / Nyquist bin of the length-tW C2R transform: imag part is discarded.
            phi = np.cos(2.0 * np.pi * c * qq / tW) / tW                   # (tW,) real
        else:
            phi = np.exp(2j * np.pi * c * qq / tW) * (2.0 / tW)            # (tW,) complex
        psi = bh[:, :, None] * phi[None, None, :]                          # (tH, M, tW)
        # out[p, q] += Yr[k, c] * Re(psi) + Yi[k, c] * (-Im(psi))
        Gr[:, ci] = np.transpose(psi.real, (1, 0, 2))
        Gi[:, ci] = -np.transpose(psi.imag, (1, 0, 2))
    Gr = Gr.reshape(M * m2, tH * tW)
    Gi = Gi.reshape(M * m2, tH * tW)
    return (E.real.astype(np.float32), E.imag.astype(np.float32),
            Gr.astype(np.float32), Gi.astype(np.float32))


def _flatten_weights(w1, w2):
    """(Cin, Cout, m1, m2) complex x2  ->  real/imag (Cin, Cout, 2*m1*m2) float32."""
    w = jnp.concatenate([w1, w2], axis=2)                 # (Cin, Cout, 2*m1, m2)
    w = w.reshape(w.shape[0], w.shape[1], -1)             # (Cin, Cout, 2*m1*m2)
    return (jnp.real(w).astype(jnp.float32), jnp.imag(w).astype(jnp.float32))


# ---------------------------------------------------------------------------
# Pallas kernel (one batch element per grid step)
# ---------------------------------------------------------------------------
def _spectral_conv2d_kernel(x_ref, er_ref, ei_ref, wr_ref, wi_ref, gr_ref, gi_ref, out_ref):
    # x_ref : (1, Cin, H*W)          er/ei : (H*W, Mm2)
    # wr/wi : (Cin, Cout, Mm2)       gr/gi : (Mm2, tH*tW)
    # out   : (1, Cout, tH*tW)
    cin = x_ref.shape[1]
    xb = x_ref[0]                                                  # (Cin, H*W)

    # (1) truncated forward rfft2: one MXU contraction over all pixels.
    xr = jnp.dot(xb, er_ref[...], preferred_element_type=jnp.float32)   # (Cin, Mm2)
    xi = jnp.dot(xb, ei_ref[...], preferred_element_type=jnp.float32)

    # (2) per-mode complex channel mixing: Y[o, m] = sum_i X[i, m] * W[i, o, m]
    #     (Cin is small; unrolled VPU FMAs, no tiny per-mode matmuls).
    yr = jnp.zeros(wr_ref.shape[1:], dtype=jnp.float32)            # (Cout, Mm2)
    yi = jnp.zeros(wr_ref.shape[1:], dtype=jnp.float32)
    for i in range(cin):
        ar = xr[i:i + 1, :]                                        # (1, Mm2)
        ai = xi[i:i + 1, :]
        wr = wr_ref[i]                                             # (Cout, Mm2)
        wi = wi_ref[i]
        yr = yr + ar * wr - ai * wi
        yi = yi + ar * wi + ai * wr

    # (3) irfft2 of the sparse spectrum: one MXU contraction, lane dim = tH*tW
    #     -> lane-dense stores, output already NCHW-compatible.
    out = (jnp.dot(yr, gr_ref[...], preferred_element_type=jnp.float32)
           + jnp.dot(yi, gi_ref[...], preferred_element_type=jnp.float32))  # (Cout, tH*tW)
    out_ref[0] = out.astype(out_ref.dtype)


# ---------------------------------------------------------------------------
# Wrapper: same semantics as SpectralConv2d.forward
# ---------------------------------------------------------------------------
def spectral_conv2d(x, weights1, weights2, modes1, modes2, target_shape):
    """x: (B, Cin, H, W) float32; weights1/2: (Cin, Cout, modes1, modes2) complex64."""
    B, Cin, H, W = x.shape
    Cin_w, Cout, m1, m2 = weights1.shape
    assert Cin_w == Cin and weights2.shape == weights1.shape
    assert m1 == modes1 and m2 == modes2
    assert 2 * modes1 <= H and modes2 <= W // 2 + 1
    tH, tW = target_shape
    Mm2 = 2 * modes1 * modes2

    er, ei, gr, gi = _build_bases(H, W, modes1, modes2, tH, tW)
    er, ei, gr, gi = (jnp.asarray(a) for a in (er, ei, gr, gi))
    wr, wi = _flatten_weights(weights1, weights2)

    # Free (contiguous) reshape only -- input stays in NCHW, no transpose / pad HBM passes.
    x2 = x.reshape(B, Cin, H * W).astype(jnp.float32)

    out = pl.pallas_call(
        _spectral_conv2d_kernel,
        out_shape=jax.ShapeDtypeStruct((B, Cout, tH * tW), jnp.float32),
        grid=(B,),
        in_specs=[
            pl.BlockSpec((1, Cin, H * W), lambda b: (b, 0, 0)),
            pl.BlockSpec((H * W, Mm2), lambda b: (0, 0)),
            pl.BlockSpec((H * W, Mm2), lambda b: (0, 0)),
            pl.BlockSpec((Cin, Cout, Mm2), lambda b: (0, 0, 0)),
            pl.BlockSpec((Cin, Cout, Mm2), lambda b: (0, 0, 0)),
            pl.BlockSpec((Mm2, tH * tW), lambda b: (0, 0)),
            pl.BlockSpec((Mm2, tH * tW), lambda b: (0, 0)),
        ],
        out_specs=pl.BlockSpec((1, Cout, tH * tW), lambda b: (b, 0, 0)),
        compiler_params=pltpu.CompilerParams(dimension_semantics=("parallel",)),
    )(x2, er, ei, wr, wi, gr, gi)

    return out.reshape(B, Cout, tH, tW)          # free reshape -> (B, Cout, tH, tW) NCHW


# ---------------------------------------------------------------------------
# Pure-JAX reference that mirrors the PyTorch module (uses jnp.fft)
# ---------------------------------------------------------------------------
def _reference_fft(x, w1, w2, m1, m2, target_shape, out_channels):
    B, Cin, H, W = x.shape
    x_ft = jnp.fft.rfft2(x)
    out_ft = jnp.zeros((B, out_channels, H, W // 2 + 1), dtype=jnp.complex64)
    out_ft = out_ft.at[:, :, :m1, :m2].set(
        jnp.einsum('bixy,ioxy->boxy', x_ft[:, :, :m1, :m2], w1))
    out_ft = out_ft.at[:, :, -m1:, :m2].set(
        jnp.einsum('bixy,ioxy->boxy', x_ft[:, :, -m1:, :m2], w2))
    return jnp.fft.irfft2(out_ft, s=target_shape)


if __name__ == "__main__":
    # Small shapes consistent with the module.
    B, Cin, Cout = 2, 4, 8
    H = W = 16
    modes1, modes2 = 4, 4
    target_shape = (16, 16)

    key = jax.random.PRNGKey(0)
    kx, k1r, k1i, k2r, k2i = jax.random.split(key, 5)

    x = jax.random.normal(kx, (B, Cin, H, W), dtype=jnp.float32)

    # Mimic: scale * torch.rand(..., dtype=cfloat)  (uniform [0,1) real & imag parts)
    scale = 1.0 / (Cin * Cout)
    w1 = (scale * (jax.random.uniform(k1r, (Cin, Cout, modes1, modes2))
                   + 1j * jax.random.uniform(k1i, (Cin, Cout, modes1, modes2)))
          ).astype(jnp.complex64)
    w2 = (scale * (jax.random.uniform(k2r, (Cin, Cout, modes1, modes2))
                   + 1j * jax.random.uniform(k2i, (Cin, Cout, modes1, modes2)))
          ).astype(jnp.complex64)

    out = spectral_conv2d(x, w1, w2, modes1, modes2, target_shape)
    out = jax.block_until_ready(out)
    assert out.shape == (B, Cout) + tuple(target_shape)

    # Validate against an FFT-based reference of the original module.
    ref = _reference_fft(x, w1, w2, modes1, modes2, target_shape, Cout)
    err = float(jnp.max(jnp.abs(out - ref)))
    assert err < 2e-2, f"max abs err {err}"

    print("KERNEL_OK")
</pallas_src>

<mosaic_0001>
module attributes {stable_mosaic.version = 11 : i64} {
  func.func @_spectral_conv2d_kernel(%arg0: i32, %arg1: memref<1x4x256xf32, #tpu.memory_space<vmem>>, %arg2: memref<256x32xf32, #tpu.memory_space<vmem>>, %arg3: memref<256x32xf32, #tpu.memory_space<vmem>>, %arg4: memref<4x8x32xf32, #tpu.memory_space<vmem>>, %arg5: memref<4x8x32xf32, #tpu.memory_space<vmem>>, %arg6: memref<32x256xf32, #tpu.memory_space<vmem>>, %arg7: memref<32x256xf32, #tpu.memory_space<vmem>>, %arg8: memref<1x8x256xf32, #tpu.memory_space<vmem>>) attributes {dimension_semantics = [#tpu.dimension_semantics<parallel>], iteration_bounds = array<i64: 2>, scalar_prefetch = 0 : i64, scratch_operands = 0 : i64, tpu.core_type = #tpu.core_type<tc>, window_params = [{transform_indices = @transform_0, window_bounds = array<i64: 1, 4, 256>}, {pipeline_mode = #tpu.pipeline_mode<synchronous>, transform_indices = @transform_1, window_bounds = array<i64: 256, 32>}, {pipeline_mode = #tpu.pipeline_mode<synchronous>, transform_indices = @transform_2, window_bounds = array<i64: 256, 32>}, {pipeline_mode = #tpu.pipeline_mode<synchronous>, transform_indices = @transform_3, window_bounds = array<i64: 4, 8, 32>}, {pipeline_mode = #tpu.pipeline_mode<synchronous>, transform_indices = @transform_4, window_bounds = array<i64: 4, 8, 32>}, {pipeline_mode = #tpu.pipeline_mode<synchronous>, transform_indices = @transform_5, window_bounds = array<i64: 32, 256>}, {pipeline_mode = #tpu.pipeline_mode<synchronous>, transform_indices = @transform_6, window_bounds = array<i64: 32, 256>}, {transform_indices = @transform_7, window_bounds = array<i64: 1, 8, 256>}]} {
    %c0 = arith.constant 0 : index
    %c0_0 = arith.constant 0 : index
    %c0_1 = arith.constant 0 : index
    %0 = vector.load %arg1[%c0, %c0_0, %c0_1] : memref<1x4x256xf32, #tpu.memory_space<vmem>>, vector<1x4x256xf32>
    %1 = vector.shape_cast %0 : vector<1x4x256xf32> to vector<4x256xf32>
    %c0_2 = arith.constant 0 : index
    %c0_3 = arith.constant 0 : index
    %2 = vector.load %arg2[%c0_2, %c0_3] : memref<256x32xf32, #tpu.memory_space<vmem>>, vector<256x32xf32>
    %cst = arith.constant dense<0.000000e+00> : vector<4x32xf32>
    %3 = tpu.matmul %1, %2, %cst {dimension_numbers = #tpu.dot_dimension_numbers<[1], [0], [0], [1], [0, 0, 1, 1], [], []>} : vector<4x256xf32>, vector<256x32xf32>, vector<4x32xf32> -> vector<4x32xf32>
    %c0_4 = arith.constant 0 : index
    %c0_5 = arith.constant 0 : index
    %4 = vector.load %arg3[%c0_4, %c0_5] : memref<256x32xf32, #tpu.memory_space<vmem>>, vector<256x32xf32>
    %cst_6 = arith.constant dense<0.000000e+00> : vector<4x32xf32>
    %5 = tpu.matmul %1, %4, %cst_6 {dimension_numbers = #tpu.dot_dimension_numbers<[1], [0], [0], [1], [0, 0, 1, 1], [], []>} : vector<4x256xf32>, vector<256x32xf32>, vector<4x32xf32> -> vector<4x32xf32>
    %cst_7 = arith.constant 0.000000e+00 : f32
    %6 = vector.broadcast %cst_7 : f32 to vector<8x32xf32>
    %cst_8 = arith.constant 0.000000e+00 : f32
    %7 = vector.broadcast %cst_8 : f32 to vector<8x32xf32>
    %8 = vector.extract_strided_slice %3 {offsets = [0, 0], sizes = [1, 32], strides = [1, 1]} : vector<4x32xf32> to vector<1x32xf32>
    %9 = vector.extract_strided_slice %5 {offsets = [0, 0], sizes = [1, 32], strides = [1, 1]} : vector<4x32xf32> to vector<1x32xf32>
    %c0_9 = arith.constant 0 : index
    %c0_10 = arith.constant 0 : index
    %c0_11 = arith.constant 0 : index
    %10 = vector.load %arg4[%c0_9, %c0_10, %c0_11] : memref<4x8x32xf32, #tpu.memory_space<vmem>>, vector<1x8x32xf32>
    %11 = vector.shape_cast %10 : vector<1x8x32xf32> to vector<8x32xf32>
    %c0_12 = arith.constant 0 : index
    %c0_13 = arith.constant 0 : index
    %c0_14 = arith.constant 0 : index
    %12 = vector.load %arg5[%c0_12, %c0_13, %c0_14] : memref<4x8x32xf32, #tpu.memory_space<vmem>>, vector<1x8x32xf32>
    %13 = vector.shape_cast %12 : vector<1x8x32xf32> to vector<8x32xf32>
    %14 = vector.broadcast %8 : vector<1x32xf32> to vector<8x32xf32>
    %15 = arith.mulf %14, %11 : vector<8x32xf32>
    %16 = arith.addf %6, %15 : vector<8x32xf32>
    %17 = vector.broadcast %9 : vector<1x32xf32> to vector<8x32xf32>
    %18 = arith.mulf %17, %13 : vector<8x32xf32>
    %19 = arith.subf %16, %18 : vector<8x32xf32>
    %20 = vector.broadcast %8 : vector<1x32xf32> to vector<8x32xf32>
    %21 = arith.mulf %20, %13 : vector<8x32xf32>
    %22 = arith.addf %7, %21 : vector<8x32xf32>
    %23 = vector.broadcast %9 : vector<1x32xf32> to vector<8x32xf32>
    %24 = arith.mulf %23, %11 : vector<8x32xf32>
    %25 = arith.addf %22, %24 : vector<8x32xf32>
    %26 = vector.extract_strided_slice %3 {offsets = [1, 0], sizes = [1, 32], strides = [1, 1]} : vector<4x32xf32> to vector<1x32xf32>
    %27 = vector.extract_strided_slice %5 {offsets = [1, 0], sizes = [1, 32], strides = [1, 1]} : vector<4x32xf32> to vector<1x32xf32>
    %c1 = arith.constant 1 : index
    %c0_15 = arith.constant 0 : index
    %c0_16 = arith.constant 0 : index
    %28 = vector.load %arg4[%c1, %c0_15, %c0_16] : memref<4x8x32xf32, #tpu.memory_space<vmem>>, vector<1x8x32xf32>
    %29 = vector.shape_cast %28 : vector<1x8x32xf32> to vector<8x32xf32>
    %c1_17 = arith.constant 1 : index
    %c0_18 = arith.constant 0 : index
    %c0_19 = arith.constant 0 : index
    %30 = vector.load %arg5[%c1_17, %c0_18, %c0_19] : memref<4x8x32xf32, #tpu.memory_space<vmem>>, vector<1x8x32xf32>
    %31 = vector.shape_cast %30 : vector<1x8x32xf32> to vector<8x32xf32>
    %32 = vector.broadcast %26 : vector<1x32xf32> to vector<8x32xf32>
    %33 = arith.mulf %32, %29 : vector<8x32xf32>
    %34 = arith.addf %19, %33 : vector<8x32xf32>
    %35 = vector.broadcast %27 : vector<1x32xf32> to vector<8x32xf32>
    %36 = arith.mulf %35, %31 : vector<8x32xf32>
    %37 = arith.subf %34, %36 : vector<8x32xf32>
    %38 = vector.broadcast %26 : vector<1x32xf32> to vector<8x32xf32>
    %39 = arith.mulf %38, %31 : vector<8x32xf32>
    %40 = arith.addf %25, %39 : vector<8x32xf32>
    %41 = vector.broadcast %27 : vector<1x32xf32> to vector<8x32xf32>
    %42 = arith.mulf %41, %29 : vector<8x32xf32>
    %43 = arith.addf %40, %42 : vector<8x32xf32>
    %44 = vector.extract_strided_slice %3 {offsets = [2, 0], sizes = [1, 32], strides = [1, 1]} : vector<4x32xf32> to vector<1x32xf32>
    %45 = vector.extract_strided_slice %5 {offsets = [2, 0], sizes = [1, 32], strides = [1, 1]} : vector<4x32xf32> to vector<1x32xf32>
    %c2 = arith.constant 2 : index
    %c0_20 = arith.constant 0 : index
    %c0_21 = arith.constant 0 : index
    %46 = vector.load %arg4[%c2, %c0_20, %c0_21] : memref<4x8x32xf32, #tpu.memory_space<vmem>>, vector<1x8x32xf32>
    %47 = vector.shape_cast %46 : vector<1x8x32xf32> to vector<8x32xf32>
    %c2_22 = arith.constant 2 : index
    %c0_23 = arith.constant 0 : index
    %c0_24 = arith.constant 0 : index
    %48 = vector.load %arg5[%c2_22, %c0_23, %c0_24] : memref<4x8x32xf32, #tpu.memory_space<vmem>>, vector<1x8x32xf32>
    %49 = vector.shape_cast %48 : vector<1x8x32xf32> to vector<8x32xf32>
    %50 = vector.broadcast %44 : vector<1x32xf32> to vector<8x32xf32>
    %51 = arith.mulf %50, %47 : vector<8x32xf32>
    %52 = arith.addf %37, %51 : vector<8x32xf32>
    %53 = vector.broadcast %45 : vector<1x32xf32> to vector<8x32xf32>
    %54 = arith.mulf %53, %49 : vector<8x32xf32>
    %55 = arith.subf %52, %54 : vector<8x32xf32>
    %56 = vector.broadcast %44 : vector<1x32xf32> to vector<8x32xf32>
    %57 = arith.mulf %56, %49 : vector<8x32xf32>
    %58 = arith.addf %43, %57 : vector<8x32xf32>
    %59 = vector.broadcast %45 : vector<1x32xf32> to vector<8x32xf32>
    %60 = arith.mulf %59, %47 : vector<8x32xf32>
    %61 = arith.addf %58, %60 : vector<8x32xf32>
    %62 = vector.extract_strided_slice %3 {offsets = [3, 0], sizes = [1, 32], strides = [1, 1]} : vector<4x32xf32> to vector<1x32xf32>
    %63 = vector.extract_strided_slice %5 {offsets = [3, 0], sizes = [1, 32], strides = [1, 1]} : vector<4x32xf32> to vector<1x32xf32>
    %c3 = arith.constant 3 : index
    %c0_25 = arith.constant 0 : index
    %c0_26 = arith.constant 0 : index
    %64 = vector.load %arg4[%c3, %c0_25, %c0_26] : memref<4x8x32xf32, #tpu.memory_space<vmem>>, vector<1x8x32xf32>
    %65 = vector.shape_cast %64 : vector<1x8x32xf32> to vector<8x32xf32>
    %c3_27 = arith.constant 3 : index
    %c0_28 = arith.constant 0 : index
    %c0_29 = arith.constant 0 : index
    %66 = vector.load %arg5[%c3_27, %c0_28, %c0_29] : memref<4x8x32xf32, #tpu.memory_space<vmem>>, vector<1x8x32xf32>
    %67 = vector.shape_cast %66 : vector<1x8x32xf32> to vector<8x32xf32>
    %68 = vector.broadcast %62 : vector<1x32xf32> to vector<8x32xf32>
    %69 = arith.mulf %68, %65 : vector<8x32xf32>
    %70 = arith.addf %55, %69 : vector<8x32xf32>
    %71 = vector.broadcast %63 : vector<1x32xf32> to vector<8x32xf32>
    %72 = arith.mulf %71, %67 : vector<8x32xf32>
    %73 = arith.subf %70, %72 : vector<8x32xf32>
    %74 = vector.broadcast %62 : vector<1x32xf32> to vector<8x32xf32>
    %75 = arith.mulf %74, %67 : vector<8x32xf32>
    %76 = arith.addf %61, %75 : vector<8x32xf32>
    %77 = vector.broadcast %63 : vector<1x32xf32> to vector<8x32xf32>
    %78 = arith.mulf %77, %65 : vector<8x32xf32>
    %79 = arith.addf %76, %78 : vector<8x32xf32>
    %c0_30 = arith.constant 0 : index
    %c0_31 = arith.constant 0 : index
    %80 = vector.load %arg6[%c0_30, %c0_31] : memref<32x256xf32, #tpu.memory_space<vmem>>, vector<32x256xf32>
    %cst_32 = arith.constant dense<0.000000e+00> : vector<8x256xf32>
    %81 = tpu.matmul %73, %80, %cst_32 {dimension_numbers = #tpu.dot_dimension_numbers<[1], [0], [0], [1], [0, 0, 1, 1], [], []>} : vector<8x32xf32>, vector<32x256xf32>, vector<8x256xf32> -> vector<8x256xf32>
    %c0_33 = arith.constant 0 : index
    %c0_34 = arith.constant 0 : index
    %82 = vector.load %arg7[%c0_33, %c0_34] : memref<32x256xf32, #tpu.memory_space<vmem>>, vector<32x256xf32>
    %cst_35 = arith.constant dense<0.000000e+00> : vector<8x256xf32>
    %83 = tpu.matmul %79, %82, %cst_35 {dimension_numbers = #tpu.dot_dimension_numbers<[1], [0], [0], [1], [0, 0, 1, 1], [], []>} : vector<8x32xf32>, vector<32x256xf32>, vector<8x256xf32> -> vector<8x256xf32>
    %84 = arith.addf %81, %83 : vector<8x256xf32>
    %c0_36 = arith.constant 0 : index
    %c0_37 = arith.constant 0 : index
    %c0_38 = arith.constant 0 : index
    %85 = vector.load %arg8[%c0_36, %c0_37, %c0_38] : memref<1x8x256xf32, #tpu.memory_space<vmem>>, vector<1x8x256xf32>
    %86 = vector.shape_cast %85 : vector<1x8x256xf32> to vector<8x256xf32>
    %87 = vector.shape_cast %84 : vector<8x256xf32> to vector<1x8x256xf32>
    tpu.vector_store %arg8[%c0_36, %c0_37, %c0_38], %87 {strides = array<i32>} : memref<1x8x256xf32, #tpu.memory_space<vmem>>, vector<1x8x256xf32>,
    return
  }
  func.func @transform_0(%arg0: i32) -> (i32, i32, i32) {
    %c0_i32 = arith.constant 0 : i32
    %c0_i32_0 = arith.constant 0 : i32
    %c0_i32_1 = arith.constant 0 : i32
    return %arg0, %c0_i32, %c0_i32_0 : i32, i32, i32
  }
  func.func @transform_1(%arg0: i32) -> (i32, i32) {
    %c0_i32 = arith.constant 0 : i32
    %c0_i32_0 = arith.constant 0 : i32
    %c0_i32_1 = arith.constant 0 : i32
    return %c0_i32, %c0_i32_0 : i32, i32
  }
  func.func @transform_2(%arg0: i32) -> (i32, i32) {
    %c0_i32 = arith.constant 0 : i32
    %c0_i32_0 = arith.constant 0 : i32
    %c0_i32_1 = arith.constant 0 : i32
    return %c0_i32, %c0_i32_0 : i32, i32
  }
  func.func @transform_3(%arg0: i32) -> (i32, i32, i32) {
    %c0_i32 = arith.constant 0 : i32
    %c0_i32_0 = arith.constant 0 : i32
    %c0_i32_1 = arith.constant 0 : i32
    %c0_i32_2 = arith.constant 0 : i32
    return %c0_i32, %c0_i32_0, %c0_i32_1 : i32, i32, i32
  }
  func.func @transform_4(%arg0: i32) -> (i32, i32, i32) {
    %c0_i32 = arith.constant 0 : i32
    %c0_i32_0 = arith.constant 0 : i32
    %c0_i32_1 = arith.constant 0 : i32
    %c0_i32_2 = arith.constant 0 : i32
    return %c0_i32, %c0_i32_0, %c0_i32_1 : i32, i32, i32
  }
  func.func @transform_5(%arg0: i32) -> (i32, i32) {
    %c0_i32 = arith.constant 0 : i32
    %c0_i32_0 = arith.constant 0 : i32
    %c0_i32_1 = arith.constant 0 : i32
    return %c0_i32, %c0_i32_0 : i32, i32
  }
  func.func @transform_6(%arg0: i32) -> (i32, i32) {
    %c0_i32 = arith.constant 0 : i32
    %c0_i32_0 = arith.constant 0 : i32
    %c0_i32_1 = arith.constant 0 : i32
    return %c0_i32, %c0_i32_0 : i32, i32
  }
  func.func @transform_7(%arg0: i32) -> (i32, i32, i32) {
    %c0_i32 = arith.constant 0 : i32
    %c0_i32_0 = arith.constant 0 : i32
    %c0_i32_1 = arith.constant 0 : i32
    return %arg0, %c0_i32, %c0_i32_0 : i32, i32, i32
  }
}

</mosaic_0001>

<bundles_post_ra>
// kernel: tpu_custom_call.1
= control target key start
LH: loop header
LB: loop body
LE: loop exit
PB: predicated region body
PF: predicated region fallthrough
CT: control target
= control target key end

     0   :  { %12 = vsyncpa [#allocation3], 0  ;;  %s1494_s0 = inlined_call_operand.vmem [shape: f32[2,4,256], index: 0, kind: input, shape index: {}]   ;;  %s1495_s1 = inlined_call_operand.vmem [shape: f32[256,32], index: 1, kind: input, shape index: {}]   ;;  %s1496_s2 = inlined_call_operand.vmem [shape: f32[256,32], index: 2, kind: input, shape index: {}]   ;;  %s1497_s3 = inlined_call_operand.vmem [shape: f32[4,8,32], index: 3, kind: input, shape index: {}]   ;;  %s1498_s4 = inlined_call_operand.vmem [shape: f32[4,8,32], index: 4, kind: input, shape index: {}]   ;;  %s1499_s5 = inlined_call_operand.vmem [shape: f32[32,256], index: 5, kind: input, shape index: {}]   ;;  %s1500_s6 = inlined_call_operand.vmem [shape: f32[32,256], index: 6, kind: input, shape index: {}]   ;;  %s1501_s7 = inlined_call_operand.hbm [shape: f32[2,8,256], index: 7, kind: output, shape index: {}]  }
   0x1   :  { %14 = vsyncpa [#allocation3 + $0x1], 0  ;;  %s1125_s24 = smov 0   ;;  %s1127_s25 = smov 0  }
   0x2   :  { %s1129_s26 = smov 0   ;;  %s1131_s27 = smov 0  }
   0x3 LB: > { %s1146_s28 = sadd.s32 4294967295, %s1081_s27   ;;  %s804_s29 = sadd.s32 4294967294, %s1081_s27   ;;  %s1081_s27 = sphi %s1131_s27, %s1507_s27   ;;  %s1077_s26 = sphi %s1129_s26, %s1506_s26   ;;  %s1073_s25 = sphi %s1127_s25, %s1505_s25   ;;  %s1069_s24 = sphi %s1125_s24, %s1504_s24  }
   0x4   : > { %s1150_s30 = sadd.s32 1, %s1081_s27   ;;  %s179_s8 = sadd.s32 1, %s1077_s26 }
   0x5   : > { %s176_s9 = ssub.s32 %s1081_s27, %s1150_s30  ;;  %p189_p0 = scmp.ne.s32.totalorder %s1077_s26, %s1073_s25 }
   0x6   : > { %p177_p1 = scmp.eq.s32.totalorder %s176_s9, 0  ;;  %p190_p2 = scmp.eq.s32.totalorder %s1146_s28, 1 }
   0x7   : > { %p195_p3 = scmp.ne.s32.totalorder %s1073_s25, %s1069_s24  ;;  %p196_p4 = scmp.eq.s32.totalorder %s804_s29, 1 }
   0x8   : > { %s1161_s10 = scalar_select %p177_p1, %s1077_s26, %s179_s8  }
   0x9   : > { %p1163_p5 = por %p190_p2, %p189_p0  ;;  %p1167_p6 = por %p196_p4, %p195_p3 }
   0xa   : > { %p807_p7 = scmp.ge.s32.totalorder %s1081_s27, 1  ;;  %p240_p8 = scmp.lt.s32.totalorder %s1081_s27, 3 }
   0xc   : > { %p241_p9 = pnand %p807_p7, %p240_p8 }
   0xd   : > { %v294_v0 = vld [vmem:[%s1495_s1 + $0x80] sm:$0xff] (!%p241_p9)  ;;  %v295_v1 = vld [vmem:[%s1495_s1 + $0x88] sm:$0xff] (!%p241_p9)  ;;  %v296_v11 = vld [vmem:[%s1495_s1 + $0x90] sm:$0xff] (!%p241_p9)  ;;  %p272_p10 = scmp.lt.s32.totalorder (!%p241_p9), %s1146_s28, 1  ;;  %vm579_vm0 = vcmask (!%p241_p9), 261120   ;;  %s269_s13 = sand.u32 (!%p241_p9), 1, %s1073_s25  }
   0xe   : > { %244 = sbr.rel (%p241_p9) target bundleno = 512 (0x200), region = 48  ;;  %v399_v2 = vld [vmem:[%s1496_s2 + $0x80] sm:$0xff] (!%p241_p9)  ;;  %v896_v3 = vpack.c.bf16 (!%p241_p9), %v295_v1, %v294_v0  ;;  %v400_v4 = vld [vmem:[%s1496_s2 + $0x88] sm:$0xff] (!%p241_p9)  ;;  %v297_v13 = vld [vmem:[%s1495_s1 + $0x98] sm:$0xff] (!%p241_p9)  ;;  %s825_s14 = sshll.u32 (!%p241_p9), %s1146_s28, 8 }
   0xf   : > { %v278_v5 = vld [vmem:[%s1495_s1] sm:$0xff] (!%p241_p9)  ;;  %v279_v6 = vld [vmem:[%s1495_s1 + $0x8] sm:$0xff] (!%p241_p9)  ;;  %v928_v7 = vpack.c.bf16 (!%p241_p9), %v400_v4, %v399_v2  ;;  %v401_v14 = vld [vmem:[%s1496_s2 + $0x90] sm:$0xff] (!%p241_p9)  ;;  %v900_v16 = vpack.c.bf16 (!%p241_p9), %v297_v13, %v296_v11  ;;  %s1452_s22 = scalar_lea.hbm (!%p241_p9), %s1501_s7, %s825_s14  ;;  %s1084_s29 = smov (!%p241_p9), [#allocation2]  }
  0x10   : > { %v898_v8 = vpack.c.bf16 (!%p241_p9), %v279_v6, %v278_v5  ;;  %v383_v9 = vld [vmem:[%s1496_s2] sm:$0xff] (!%p241_p9)  ;;  %v384_v10 = vld [vmem:[%s1496_s2 + $0x8] sm:$0xff] (!%p241_p9)  ;;  %897 = vmatprep.subr.bf16.mxu0 (!%p241_p9), %v896_v3  ;;  %v402_v15 = vld [vmem:[%s1496_s2 + $0x98] sm:$0xff] (!%p241_p9)  ;;  %s1023_s8 = sshll.u32 (!%p241_p9), %s1084_s29, 4  ;;  %s1024_s8 = int_to_ptr.vmem [resolvable:$false] %s1023_s8 }
  0x11   : > { %v930_v12 = vpack.c.bf16 (!%p241_p9), %v384_v10, %v383_v9  ;;  %929 = vmatprep.subr.bf16.mxu1 (!%p241_p9), %v928_v7  ;;  %v932_v17 = vpack.c.bf16 (!%p241_p9), %v402_v15, %v401_v14  ;;  %v280_v18 = vld [vmem:[%s1495_s1 + $0x10] sm:$0xff] (!%p241_p9)  ;;  %v281_v19 = vld [vmem:[%s1495_s1 + $0x18] sm:$0xff] (!%p241_p9)  ;;  %v298_v23 = vld [vmem:[%s1495_s1 + $0xa0] sm:$0xff] (!%p241_p9) }
  0x12   : > { %899 = vmatpush3.bf16.msra.mxu0 (!%p241_p9), %v898_v8  ;;  %v385_v20 = vld [vmem:[%s1496_s2 + $0x10] sm:$0xff] (!%p241_p9)  ;;  %v902_v21 = vpack.c.bf16 (!%p241_p9), %v281_v19, %v280_v18  ;;  %v386_v22 = vld [vmem:[%s1496_s2 + $0x18] sm:$0xff] (!%p241_p9)  ;;  %v299_v24 = vld [vmem:[%s1495_s1 + $0xa8] sm:$0xff] (!%p241_p9) }
  0x13   : > { %931 = vmatpush3.bf16.msra.mxu1 (!%p241_p9), %v930_v12  ;;  %901 = vmatprep.subr.bf16.mxu0 (!%p241_p9), %v900_v16  ;;  %v934_v25 = vpack.c.bf16 (!%p241_p9), %v386_v22, %v385_v20  ;;  %v904_v26 = vpack.c.bf16 (!%p241_p9), %v299_v24, %v298_v23  ;;  %v403_v27 = vld [vmem:[%s1496_s2 + $0xa0] sm:$0xff] (!%p241_p9)  ;;  %v404_v28 = vld [vmem:[%s1496_s2 + $0xa8] sm:$0xff] (!%p241_p9)  ;;  %v300_v35 = vld [vmem:[%s1495_s1 + $0xb0] sm:$0xff] (!%p241_p9) }
  0x14   : > { %933 = vmatprep.subr.bf16.mxu1 (!%p241_p9), %v932_v17  ;;  %v282_v29 = vld [vmem:[%s1495_s1 + $0x20] sm:$0xff] (!%p241_p9)  ;;  %v936_v30 = vpack.c.bf16 (!%p241_p9), %v404_v28, %v403_v27  ;;  %v283_v31 = vld [vmem:[%s1495_s1 + $0x28] sm:$0xff] (!%p241_p9)  ;;  %v301_v36 = vld [vmem:[%s1495_s1 + $0xb8] sm:$0xff] (!%p241_p9) }
  0x15   : > { %v387_v32 = vld [vmem:[%s1496_s2 + $0x20] sm:$0xff]  ;;  %v388_v33 = vld [vmem:[%s1496_s2 + $0x28] sm:$0xff]  ;;  %v906_v34 = vpack.c.bf16 %v283_v31, %v282_v29  ;;  %v405_v37 = vld [vmem:[%s1496_s2 + $0xb0] sm:$0xff]  ;;  %v908_v39 = vpack.c.bf16 %v301_v36, %v300_v35  ;;  %s1285_s15 = scalar_select %p272_p10, %s1146_s28, 1 }
  0x16   : > { %903 = vmatpush3.bf16.msra.mxu0 %v902_v21  ;;  %v938_v38 = vpack.c.bf16 %v388_v33, %v387_v32  ;;  %v406_v40 = vld [vmem:[%s1496_s2 + $0xb8] sm:$0xff]  ;;  %v284_v41 = vld [vmem:[%s1495_s1 + $0x30] sm:$0xff]  ;;  %v302_v46 = vld [vmem:[%s1495_s1 + $0xc0] sm:$0xff]  ;;  %s731_s28 = scalar_lea.sflag [#allocation3], %s269_s13 }
  0x17   : > { %935 = vmatpush3.bf16.msra.mxu1 %v934_v25  ;;  %905 = vmatprep.subr.bf16.mxu0 %v904_v26  ;;  %v285_v42 = vld [vmem:[%s1495_s1 + $0x38] sm:$0xff]  ;;  %v940_v43 = vpack.c.bf16 %v406_v40, %v405_v37  ;;  %v389_v44 = vld [vmem:[%s1496_s2 + $0x30] sm:$0xff]  ;;  %v303_v47 = vld [vmem:[%s1495_s1 + $0xc8] sm:$0xff]  ;;  %s824_s19 = sshll.u32 %s1285_s15, 3  ;;  %s1025_s15 = scalar_lea.vmem %s1024_s8, 512 }
  0x18   : > { %937 = vmatprep.subr.bf16.mxu1 %v936_v30  ;;  %v390_v45 = vld [vmem:[%s1496_s2 + $0x38] sm:$0xff]  ;;  %v407_v48 = vld [vmem:[%s1496_s2 + $0xc0] sm:$0xff]  ;;  %v408_v49 = vld [vmem:[%s1496_s2 + $0xc8] sm:$0xff]  ;;  %v910_v50 = vpack.c.bf16 %v285_v42, %v284_v41  ;;  %v912_v52 = vpack.c.bf16 %v303_v47, %v302_v46  ;;  %s276_s21 = scalar_lea.vmem %s1494_s0, %s824_s19  ;;  %s808_s19 = sshll.u32 %s269_s13, 4 }
  0x19   : > { %v942_v51 = vpack.c.bf16 %v390_v45, %v389_v44  ;;  %v286_v53 = vld [vmem:[%s1495_s1 + $0x40] sm:$0xff]  ;;  %v287_v54 = vld [vmem:[%s1495_s1 + $0x48] sm:$0xff]  ;;  %v944_v56 = vpack.c.bf16 %v408_v49, %v407_v48  ;;  %v304_v58 = vld [vmem:[%s1495_s1 + $0xd0] sm:$0xff]  ;;  %s271_s16 = scalar_lea.vmem [#allocation2], %s808_s19 }
  0x1a   : > { %907 = vmatpush3.bf16.msra.mxu0 %v906_v34  ;;  %v391_v55 = vld [vmem:[%s1496_s2 + $0x40] sm:$0xff]  ;;  %v392_v57 = vld [vmem:[%s1496_s2 + $0x48] sm:$0xff]  ;;  %v305_v59 = vld [vmem:[%s1495_s1 + $0xd8] sm:$0xff]  ;;  %v914_v62 = vpack.c.bf16 %v287_v54, %v286_v53  ;;  %v1083_v53 = vmov 0.0   ;;  %s745_s17 = sshll.u32 %s271_s16, 4  ;;  %s1454_s17 = int_to_ptr.vmem [resolvable:$true] %s745_s17 }
  0x1b   : > { %939 = vmatpush3.bf16.msra.mxu1 %v938_v38  ;;  %909 = vmatprep.subr.bf16.mxu0 %v908_v39  ;;  %v409_v60 = vld [vmem:[%s1496_s2 + $0xd0] sm:$0xff]  ;;  %v410_v61 = vld [vmem:[%s1496_s2 + $0xd8] sm:$0xff]  ;;  %v946_v63 = vpack.c.bf16 %v392_v57, %v391_v55  ;;  %v916_v0 = vpack.c.bf16 %v305_v59, %v304_v58  ;;  %v306_v6 = vld [vmem:[%s1495_s1 + $0xe0] sm:$0xff]  ;;  %v487_v59 = vlaneseq  ;;  %s1019_s23 = scalar_lea.vmem %s1454_s17, 256  ;;  %p1026_p0 = scmp.lt.s32.totalorder %s1454_s17, %s1024_s8 }
  0x1c   : > { %941 = vmatprep.subr.bf16.mxu1 %v940_v43  ;;  %v288_v1 = vld [vmem:[%s1495_s1 + $0x50] sm:$0xff]  ;;  %v289_v2 = vld [vmem:[%s1495_s1 + $0x58] sm:$0xff]  ;;  %v948_v4 = vpack.c.bf16 %v410_v61, %v409_v60  ;;  %v307_v7 = vld [vmem:[%s1495_s1 + $0xe8] sm:$0xff]  ;;  %p1020_p11 = scmp.ne.s32.totalorder %s1454_s17, %s1019_s23  ;;  %p1027_p1 = scmp.lt.s32.totalorder %s1025_s15, %s1019_s23 }
  0x1d   : > { %v393_v3 = vld [vmem:[%s1496_s2 + $0x50] sm:$0xff]  ;;  %v394_v5 = vld [vmem:[%s1496_s2 + $0x58] sm:$0xff]  ;;  %v411_v8 = vld [vmem:[%s1496_s2 + $0xe0] sm:$0xff]  ;;  %v918_v10 = vpack.c.bf16 %v289_v2, %v288_v1  ;;  %v920_v13 = vpack.c.bf16 %v307_v7, %v306_v6  ;;  %v488_v60 = vshrl.u32 %v487_v59, 7 }
  0x1e   : > { %911 = vmatpush3.bf16.msra.mxu0 %v910_v50  ;;  %v412_v9 = vld [vmem:[%s1496_s2 + $0xe8] sm:$0xff]  ;;  %v290_v11 = vld [vmem:[%s1495_s1 + $0x60] sm:$0xff]  ;;  %v950_v12 = vpack.c.bf16 %v394_v5, %v393_v3  ;;  %v308_v19 = vld [vmem:[%s1495_s1 + $0xf0] sm:$0xff]  ;;  %p1021_p12 = pnand %p1020_p11, %p1163_p5  ;;  %p1028_p2 = por %p1027_p1, %p1026_p0 }
  0x1f   : > { %943 = vmatpush3.bf16.msra.mxu1 %v942_v51  ;;  %913 = vmatprep.subr.bf16.mxu0 %v912_v52  ;;  %v291_v14 = vld [vmem:[%s1495_s1 + $0x68] sm:$0xff]  ;;  %v395_v15 = vld [vmem:[%s1496_s2 + $0x60] sm:$0xff]  ;;  %v952_v17 = vpack.c.bf16 %v412_v9, %v411_v8  ;;  %v309_v20 = vld [vmem:[%s1495_s1 + $0xf8] sm:$0xff]  ;;  %v509_v2 = vsub.s32 1, %v488_v60  ;;  %v529_v8 = vsub.s32 2, %v488_v60 }
  0x20   : > { %945 = vmatprep.subr.bf16.mxu1 %v944_v56  ;;  %v277_v16 = vld [vmem:[%s276_s21] sm:$0xff]  ;;  %v396_v18 = vld [vmem:[%s1496_s2 + $0x68] sm:$0xff]  ;;  %v413_v22 = vld [vmem:[%s1496_s2 + $0xf0] sm:$0xff]  ;;  %v922_v24 = vpack.c.bf16 %v291_v14, %v290_v11  ;;  %v924_v26 = vpack.c.bf16 %v309_v20, %v308_v19  ;;  %v549_v19 = vsub.s32 3, %v488_v60  ;;  %p1022_p13 = pneg %p1021_p12 }
  0x21   : > { %v311_v21 = vcombine.high %v277_v16, %v277_v16  ;;  %v414_v23 = vld [vmem:[%s1496_s2 + $0xf8] sm:$0xff]  ;;  %v954_v25 = vpack.c.bf16 %v396_v18, %v395_v15  ;;  %v292_v27 = vld [vmem:[%s1495_s1 + $0x70] sm:$0xff]  ;;  %v572_v34 = vld [vmem:[%s1500_s6 + $0x8] sm:$0xff] }
  0x22   : > { %915 = vmatpush3.bf16.msra.mxu0 %v914_v62  ;;  %v293_v28 = vld [vmem:[%s1495_s1 + $0x78] sm:$0xff]  ;;  %v956_v29 = vpack.c.bf16 %v414_v23, %v413_v22  ;;  %v397_v30 = vld [vmem:[%s1496_s2 + $0x70] sm:$0xff]  ;;  %v564_v36 = vld [vmem:[%s1499_s5 + $0x8] sm:$0xff]  ;;  %v489_v62 = vsub.s32 0, %v488_v60  ;;  %p1029_p3 = pnand %p1028_p2, %p1022_p13 }
  0x23   : > { %947 = vmatpush3.bf16.msra.mxu1 %v946_v63  ;;  %917 = vmatprep.subr.bf16.mxu0 %v916_v0  ;;  %v398_v31 = vld [vmem:[%s1496_s2 + $0x78] sm:$0xff]  ;;  %v926_v32 = vpack.c.bf16 %v293_v28, %v292_v27  ;;  %v571_v39 = vld [vmem:[%s1500_s6] sm:$0xff]  ;;  %v573_v40 = vld [vmem:[%s1500_s6 + $0x10] sm:$0xff] }
  0x24   : > { %949 = vmatprep.subr.bf16.mxu1 %v948_v4  ;;  %377 = vmatprep.mubr.f32.mxu0 %v311_v21  ;;  %v958_v33 = vpack.c.bf16 %v398_v31, %v397_v30  ;;  %v574_v35 = vld [vmem:[%s1500_s6 + $0x18] sm:$0xff]  ;;  %v962_v42 = vpack.c.bf16 %v573_v40, %v571_v39  ;;  %v563_v43 = vld [vmem:[%s1499_s5] sm:$0xff]  ;;  %v565_v44 = vld [vmem:[%s1499_s5 + $0x10] sm:$0xff] }
  0x25   : > { %479 = vmatprep.mubr.f32.mxu1 %v311_v21  ;;  %v960_v37 = vpack.c.bf16 %v574_v35, %v572_v34  ;;  %v566_v38 = vld [vmem:[%s1499_s5 + $0x18] sm:$0xff]  ;;  %v970_v45 = vpack.c.bf16 %v565_v44, %v563_v43  ;;  %v576_v46 = vld [vmem:[%s1500_s6 + $0x28] sm:$0xff]  ;;  %v575_v51 = vld [vmem:[%s1500_s6 + $0x20] sm:$0xff] }
  0x26   : > { %919 = vmatpush3.bf16.msra.mxu0 %v918_v10  ;;  %v968_v41 = vpack.c.bf16 %v566_v38, %v564_v36  ;;  %v578_v47 = vld [vmem:[%s1500_s6 + $0x38] sm:$0xff]  ;;  %v568_v48 = vld [vmem:[%s1499_s5 + $0x28] sm:$0xff]  ;;  %v577_v52 = vld [vmem:[%s1500_s6 + $0x30] sm:$0xff] }
  0x27   : > { %951 = vmatpush3.bf16.msra.mxu1 %v950_v12  ;;  %921 = vmatprep.subr.bf16.mxu0 %v920_v13  ;;  %v964_v49 = vpack.c.bf16 %v578_v47, %v576_v46  ;;  %v570_v50 = vld [vmem:[%s1499_s5 + $0x38] sm:$0xff]  ;;  %v966_v55 = vpack.c.bf16 %v577_v52, %v575_v51  ;;  %v567_v56 = vld [vmem:[%s1499_s5 + $0x20] sm:$0xff]  ;;  %v569_v57 = vld [vmem:[%s1499_s5 + $0x30] sm:$0xff] }
  0x28   : > { %953 = vmatprep.subr.bf16.mxu1 %v952_v17  ;;  %v972_v54 = vpack.c.bf16 %v570_v50, %v568_v48  ;;  %v974_v58 = vpack.c.bf16 %v569_v57, %v567_v56  ;;  %v485_v4 = vld [vmem:[%s1497_s3] sm:$0xff]  ;;  %v811_v13 = vld [vmem:[%s1497_s3 + $0x8] sm:$0xff]  ;;  %v815_v36 = vld [vmem:[%s1497_s3 + $0x18] sm:$0xff] }
  0x29   : > { %v486_v5 = vld [vmem:[%s1498_s4] sm:$0xff]  ;;  %v812_v14 = vld [vmem:[%s1498_s4 + $0x8] sm:$0xff] }
  0x2a   : > { %923 = vmatpush3.bf16.msra.mxu0 %v922_v24  ;;  %v813_v24 = vld [vmem:[%s1497_s3 + $0x10] sm:$0xff] }
  0x2b   : > { %955 = vmatpush3.bf16.msra.mxu1 %v954_v25  ;;  %925 = vmatprep.subr.bf16.mxu0 %v924_v26  ;;  %v814_v25 = vld [vmem:[%s1498_s4 + $0x10] sm:$0xff] }
  0x2c   : > { %957 = vmatprep.subr.bf16.mxu1 %v956_v29 }
  0x2e   : > { %927 = vmatpush3.bf16.msra.mxu0 %v926_v32 }
  0x2f   : > { %959 = vmatpush3.bf16.msra.mxu1 %v958_v33  ;;  %969 = vmatprep.subr.bf16.mxu0 %v968_v41 }
  0x30   : > { %961 = vmatprep.subr.bf16.mxu1 %v960_v37  ;;  %v816_v37 = vld [vmem:[%s1498_s4 + $0x18] sm:$0xff] }
  0x31   : > { %378 = vmatmul.mubr.f32.vlgmr.msra.gmra.mrb[0].mxu0 %v277_v16 }
  0x32   : > { %480 = vmatmul.mubr.f32.vlgmr.msra.gmra.mrb[0].mxu1 %v277_v16  ;;  %971 = vmatpush1.bf16.msra.mxu0 %v970_v45 }
  0x33   : > { %963 = vmatpush1.bf16.msra.mxu1 %v962_v42  ;;  %647 = vmatprep.mubr.f32.mxu1 %v1083_v53 }
  0x34   : > { %721 = vmatprep.mubr.f32.mxu0 %v1083_v53  ;;  %965 = vmatprep.subr.bf16.mxu1 %v964_v49 }
  0x35   : > { %973 = vmatprep.subr.bf16.mxu0 %v972_v54 }
  0x36   : > { %975 = vmatpush1.bf16.msra.mxu0 %v974_v58 }
  0x37   : > { %967 = vmatpush1.bf16.msra.mxu1 %v966_v55 }
 0x104   : > { %v858_v61 = vpop.f32.mrb[0].mxu0 }
 0x105   : > { %v893_v63 = vpop.f32.mrb[0].mxu1  ;;  %v859_v0 = vpop.f32.mrb[1].mxu0 }
 0x106   : > { %v860_v1 = vadd.f32 %v859_v0, %v858_v61  ;;  %v894_v3 = vpop.f32.mrb[1].mxu1 }
 0x107   : > { %v895_v6 = vadd.f32 %v894_v3, %v893_v63 }
 0x108   : > { %v490_v7 = vrot.slane %v860_v1, %v489_v62  ;;  %v510_v12 = vrot.slane %v860_v1, %v509_v2  ;;  %v530_v18 = vrot.slane %v860_v1, %v529_v8  ;;  %v550_v31 = vrot.slane %v860_v1, %v549_v19 }
 0x109   : > { %v496_v9 = vrot.slane %v895_v6, %v489_v62  ;;  %v516_v17 = vrot.slane %v895_v6, %v509_v2  ;;  %v536_v26 = vrot.slane %v895_v6, %v529_v8  ;;  %v556_v38 = vrot.slane %v895_v6, %v549_v19 }
 0x10a   : > { %v491_v10 = vmul.f32 %v490_v7, %v485_v4  ;;  %v499_v11 = vmul.f32 %v490_v7, %v486_v5  ;;  %v511_v20 = vmul.f32 %v811_v13, %v510_v12  ;;  %v519_v21 = vmul.f32 %v812_v14, %v510_v12 }
 0x10b   : > { %v497_v15 = vmul.f32 %v496_v9, %v486_v5  ;;  %v501_v16 = vmul.f32 %v496_v9, %v485_v4  ;;  %v517_v28 = vmul.f32 %v812_v14, %v516_v17  ;;  %v521_v30 = vmul.f32 %v811_v13, %v516_v17 }
 0x10c   : > { %v531_v32 = vmul.f32 %v813_v24, %v530_v18  ;;  %v539_v33 = vmul.f32 %v814_v25, %v530_v18  ;;  %v537_v40 = vmul.f32 %v814_v25, %v536_v26  ;;  %v541_v42 = vmul.f32 %v813_v24, %v536_v26 }
 0x10d   : > { %v498_v22 = vsub.f32 %v491_v10, %v497_v15  ;;  %v502_v23 = vadd.f32 %v501_v16, %v499_v11  ;;  %v551_v43 = vmul.f32 %v815_v36, %v550_v31  ;;  %v559_v44 = vmul.f32 %v816_v37, %v550_v31 }
 0x10e   : > { %v557_v47 = vmul.f32 %v816_v37, %v556_v38  ;;  %v561_v48 = vmul.f32 %v815_v36, %v556_v38 }
 0x10f   : > { %v512_v27 = vadd.f32 %v511_v20, %v498_v22  ;;  %v520_v29 = vadd.f32 %v519_v21, %v502_v23 }
 0x111   : > { %v518_v34 = vsub.f32 %v512_v27, %v517_v28  ;;  %v522_v35 = vadd.f32 %v521_v30, %v520_v29 }
 0x113   : > { %v532_v39 = vadd.f32 %v531_v32, %v518_v34  ;;  %v540_v41 = vadd.f32 %v539_v33, %v522_v35 }
 0x115   : > { %v538_v45 = vsub.f32 %v532_v39, %v537_v40  ;;  %v542_v46 = vadd.f32 %v541_v42, %v540_v41 }
 0x117   : > { %v560_v49 = vadd.f32 %v559_v44, %v542_v46  ;;  %v552_v50 = vadd.f32 %v551_v43, %v538_v45 }
 0x119   : > { %v562_v51 = vadd.f32 %v561_v48, %v560_v49  ;;  %v558_v52 = vsub.f32 %v552_v50, %v557_v47 }
 0x11b   : > { %817 = vmatmul.mubr.msk.f32.vlgmr.msra.gmra.mrb[2].mxu1 %vm579_vm0, %v562_v51  ;;  %818 = vmatmul.mubr.msk.f32.vlgmr.msra.gmra.mrb[2].mxu0 %vm579_vm0, %v558_v52 }
 0x1ee   : > { %v649_v53 = vpop.f32.mrb[2].mxu1  ;;  %v723_v54 = vpop.f32.mrb[2].mxu0 }
 0x1ef   : > { %v724_v55 = vadd.f32 %v723_v54, %v649_v53  ;;  %v651_v56 = vpop.f32.mrb[3].mxu1  ;;  %v725_v57 = vpop.f32.mrb[3].mxu0 }
 0x1f0   : > { %v726_v58 = vadd.f32 %v725_v57, %v651_v56 }
 0x1f1   : > { %728 = vst [vmem:[%s271_s16] sm:$0xff] %v724_v55 }
 0x1f2   : > { %729 = vst [vmem:[%s271_s16 + $0x8] sm:$0xff] %v726_v58 }
 0x1f3   : > { %1032 = shalt.err (!%p1029_p3)
}
 0x1f4   : > { %s1033_s21 = scalar_lea.hbm %s1452_s22, 256  ;;  %s1037_s19 = scalar_lea.hbm %s1501_s7, 512 }
 0x1f5   : > { %p1034_p4 = scmp.ne.s32.totalorder %s1452_s22, %s1033_s21  ;;  %p1038_p9 = scmp.lt.u32.totalorder %s1452_s22, %s1501_s7 }
 0x1f6   : > { %p1039_p10 = scmp.lt.u32.totalorder %s1037_s19, %s1033_s21  ;;  %p1041_p12 = scmp.lt.u32.totalorder %s1033_s21, %s1452_s22 }
 0x1f7   : > { %p1035_p7 = pnand %p1034_p4, %p1163_p5 }
 0x1f8   : > { %p1040_p11 = por %p1039_p10, %p1038_p9 }
 0x1f9   : > { %p1036_p8 = pneg %p1035_p7 }
 0x1fa   : > { %p1042_p13 = por %p1041_p12, %p1040_p11 }
 0x1fc   : > { %p1043_p0 = pnand %p1042_p13, %p1036_p8 }
 0x1fe   : > { %1046 = shalt.err (!%p1043_p0)
}
 0x1ff   : > { %978 = dma.vmem_to_hbm [thread:$0]  (%p1163_p5), %s1454_s17, 256, %s1452_s22, %s731_s28  }
 0x200 PF: > { %p984_p1 = scmp.ge.s32.totalorder %s1081_s27, 2  ;;  %s757_s18 = sand.u32 1, %s1069_s24  }
 0x201   : > { %s758_s20 = scalar_lea.sflag [#allocation3], %s757_s18 }
 0x202   : > { %p981_p2 = pnand %p984_p1, %p1167_p6 }
 0x204   : > { %1064 = dma.done.wait (!%p981_p2), %s758_s20, 256  }
 0x205   : > { %1066 = vsyncadd (!%p981_p2), %s758_s20, 4294967040  ;;  %p17_p3 = scmp.ge.s32.totalorder %s1150_s30, 4   ;;  %s1504_s24 = smov %s1073_s25 }
 0x206   : > { %s1505_s25 = smov %s1077_s26  ;;  %s1506_s26 = smov %s1161_s10 }
 0x207   : > { %s1507_s27 = smov %s1150_s30  ;;  %19 = sbr.rel (!%p17_p3) target bundleno = 3 (0x3), region = 89 }
 0x20e   :  { %763 = vsyncpa [#allocation3], 1 }
 0x20f   :  { %765 = vsyncpa [#allocation3 + $0x1], 1 }

</bundles_post_ra>
